<compile_context>
chip_gen: v5e
topology: v5e:2x2
jax: 0.10.0
libtpu: 0.0.40
codegen_flags: <defaults>
</compile_context>

<pallas_src>
import functools

import jax
import jax.numpy as jnp
from jax.experimental import pallas as pl
from jax.experimental.pallas import tpu as pltpu


def _classifier_kernel(x_ref, *rest, s0, s1, num_layers, binary):
    """rest = (w0_full, b0, w1, b1, ..., w_{L-1}, b_{L-1}, logits_ref, label_ref).

    NOTE: on a partial tail tile the out-of-bounds rows of the x block contain
    unspecified data; their logits/labels are computed but the corresponding
    output rows are discarded by Pallas.  This is benign because the kernel
    has no cross-row reductions -- do not "fix" it by reading those rows.
    """
    param_refs = rest[:-2]
    logits_ref = rest[-2]
    label_ref = rest[-1]

    x = x_ref[...]                                    # (TB, input_dim), f32

    # --- MLP hot path -------------------------------------------------------
    # Layer 0 uses W0_full with rows s0:s1 zeroed, so
    #   x @ W0_full == concat(x[:, :s0], x[:, s1:]) @ W0
    # exactly, with no slicing/concat of x inside the kernel.
    h = x
    for layer in range(num_layers):
        w = param_refs[2 * layer][...]
        b = param_refs[2 * layer + 1][...]
        h = jnp.dot(h, w, preferred_element_type=jnp.float32) + b
        if layer < num_layers - 1:
            h = jnp.where(h > 0, h, 0.2 * h)          # LeakyReLU(0.2)
            # Dropout(0.5) is identity at inference time.
            # TODO(synk): training-mode stochastic dropout not implemented.
    if binary:
        h = jax.nn.sigmoid(h)
    logits_ref[...] = h.astype(logits_ref.dtype)

    # --- label = argmax over the target one-hot columns ----------------------
    t = x[:, s0:s1]
    width = s1 - s0
    if width == 2:
        # Binary: single compare (first-index-of-max tie-break preserved).
        label = (t[:, 1:2] > t[:, 0:1]).astype(jnp.int32)
    else:
        col = jax.lax.broadcasted_iota(jnp.int32, t.shape, 1)
        maxv = jnp.max(t, axis=-1, keepdims=True)
        label = jnp.min(jnp.where(t == maxv, col, width), axis=-1, keepdims=True)
    label_ref[...] = label


def init_classifier_params(key, input_dim, class_dims, st_ed):
    """Deterministic parameter init mirroring the PyTorch module's layer shapes."""
    width = st_ed[1] - st_ed[0]
    dim = input_dim - width
    out_dim = 1 if width == 2 else width
    dims = [dim] + list(class_dims) + [out_dim]
    params = []
    for i in range(len(dims) - 1):
        fan_in, fan_out = dims[i], dims[i + 1]
        key, k_w, k_b = jax.random.split(key, 3)
        bound = 1.0 / (fan_in ** 0.5)
        w = jax.random.uniform(k_w, (fan_in, fan_out), jnp.float32, -bound, bound)
        b = jax.random.uniform(k_b, (1, fan_out), jnp.float32, -bound, bound)
        params.append((w, b))
    return params


def _round_up(n, m):
    return ((n + m - 1) // m) * m


def classifier_forward(x, params, st_ed, tile_batch=2048):
    """Pallas-backed equivalent of Classifier.forward (inference semantics)."""
    s0, s1 = st_ed
    width = s1 - s0
    binary = (width == 2)

    batch, input_dim = x.shape
    num_layers = len(params)
    out_dim = params[-1][0].shape[1]

    # One-time zero-row-padded first-layer weight: replaces both the per-call
    # concat over x and the previous split-weight double dot.
    w0, b0 = params[0]
    h0 = w0.shape[1]
    w0_full = jnp.zeros((input_dim, h0), w0.dtype)
    w0_full = w0_full.at[:s0, :].set(w0[:s0])
    w0_full = w0_full.at[s1:, :].set(w0[s0:])
    flat_params = [w0_full, b0]
    for w, b in params[1:]:
        flat_params += [w, b]

    # Balanced batch tiling: near-equal tiles, each a multiple of 8 rows.
    tb_req = max(8, min(tile_batch, _round_up(batch, 8)))
    num_tiles = -(-batch // tb_req)
    tb = _round_up(-(-batch // num_tiles), 8)
    grid = (pl.cdiv(batch, tb),)

    x_spec = pl.BlockSpec((tb, input_dim), lambda i: (i, 0))
    # Constant index_map: params stay VMEM-resident across batch tiles.
    param_specs = [pl.BlockSpec(p.shape, lambda i: (0, 0)) for p in flat_params]
    out_specs = (
        pl.BlockSpec((tb, out_dim), lambda i: (i, 0)),   # logits, final dtype/shape
        pl.BlockSpec((tb, 1), lambda i: (i, 0)),         # int32 label column
    )
    out_shape = (
        jax.ShapeDtypeStruct((batch, out_dim), jnp.float32),
        jax.ShapeDtypeStruct((batch, 1), jnp.int32),
    )

    kernel = functools.partial(
        _classifier_kernel, s0=s0, s1=s1, num_layers=num_layers, binary=binary)

    logits, label = pl.pallas_call(
        kernel,
        out_shape=out_shape,
        grid=grid,
        in_specs=[x_spec] + param_specs,
        out_specs=out_specs,
        # Batch tiles are independent; "parallel" is portable across v5e/v6e/v7x.
        # (On v7x, pltpu.CORE_PARALLEL on this axis would explicitly shard the
        #  balanced tiles across both TensorCores.)
        compiler_params=pltpu.CompilerParams(
            dimension_semantics=("parallel",)),
    )(x, *flat_params)

    label = label.reshape(-1)
    if binary:
        return logits.reshape(-1), label
    return logits, label


def _reference_forward(x, params, st_ed):
    """Pure-JAX reference for correctness checking."""
    s0, s1 = st_ed
    width = s1 - s0
    label = jnp.argmax(x[:, s0:s1], axis=-1).astype(jnp.int32)
    h = jnp.concatenate([x[:, :s0], x[:, s1:]], axis=1)
    for i, (w, b) in enumerate(params):
        h = h @ w + b
        if i < len(params) - 1:
            h = jnp.where(h > 0, h, 0.2 * h)
    if width == 2:
        return jax.nn.sigmoid(h).reshape(-1), label
    return h, label


if __name__ == "__main__":
    key = jax.random.PRNGKey(0)

    # Case 1: binary target column (st_ed width == 2) -> Sigmoid head, view(-1)
    batch, input_dim, st_ed = 8, 38, (16, 18)
    class_dims = (64, 32)
    k_x, k_p, k_x2 = jax.random.split(key, 3)
    x = jax.random.normal(k_x, (batch, input_dim), jnp.float32)
    params = init_classifier_params(k_p, input_dim, class_dims, st_ed)

    preds, labels = classifier_forward(x, params, st_ed)
    jax.block_until_ready((preds, labels))
    ref_preds, ref_labels = _reference_forward(x, params, st_ed)
    assert preds.shape == (batch,)
    assert labels.shape == (batch,)
    assert labels.dtype == jnp.int32
    assert jnp.allclose(preds, ref_preds, atol=1e-5, rtol=1e-5)
    assert jnp.array_equal(labels, ref_labels)

    # Case 2: multi-class target column -> plain Linear head (logits)
    st_ed_mc = (10, 15)  # width 5
    params_mc = init_classifier_params(k_p, input_dim, class_dims, st_ed_mc)
    preds_mc, labels_mc = classifier_forward(x, params_mc, st_ed_mc)
    jax.block_until_ready((preds_mc, labels_mc))
    ref_preds_mc, ref_labels_mc = _reference_forward(x, params_mc, st_ed_mc)
    assert preds_mc.shape == (batch, 5)
    assert jnp.allclose(preds_mc, ref_preds_mc, atol=1e-5, rtol=1e-5)
    assert jnp.array_equal(labels_mc, ref_labels_mc)

    # Case 3: larger ragged batch with a small tile_batch -> exercises the
    # balanced multi-tile grid (3 tiles of 208 rows) and the partial tail
    # block (padded OOB reads / discarded OOB writes).
    batch_big = 601
    x_big = jax.random.normal(k_x2, (batch_big, input_dim), jnp.float32)
    preds_big, labels_big = classifier_forward(x_big, params, st_ed, tile_batch=256)
    jax.block_until_ready((preds_big, labels_big))
    ref_preds_big, ref_labels_big = _reference_forward(x_big, params, st_ed)
    assert preds_big.shape == (batch_big,)
    assert jnp.allclose(preds_big, ref_preds_big, atol=1e-5, rtol=1e-5)
    assert jnp.array_equal(labels_big, ref_labels_big)

    print("KERNEL_OK")
</pallas_src>

<mosaic_0001>
module attributes {stable_mosaic.version = 11 : i64} {
  func.func @_classifier_kernel(%arg0: i32, %arg1: memref<8x38xf32, #tpu.memory_space<vmem>>, %arg2: memref<38x64xf32, #tpu.memory_space<vmem>>, %arg3: memref<1x64xf32, #tpu.memory_space<vmem>>, %arg4: memref<64x32xf32, #tpu.memory_space<vmem>>, %arg5: memref<1x32xf32, #tpu.memory_space<vmem>>, %arg6: memref<32x1xf32, #tpu.memory_space<vmem>>, %arg7: memref<1x1xf32, #tpu.memory_space<vmem>>, %arg8: memref<8x1xf32, #tpu.memory_space<vmem>>, %arg9: memref<8x1xi32, #tpu.memory_space<vmem>>) attributes {dimension_semantics = [#tpu.dimension_semantics<parallel>], iteration_bounds = array<i64: 1>, scalar_prefetch = 0 : i64, scratch_operands = 0 : i64, tpu.core_type = #tpu.core_type<tc>, window_params = [{transform_indices = @transform_0, window_bounds = array<i64: 8, 38>}, {pipeline_mode = #tpu.pipeline_mode<synchronous>, transform_indices = @transform_1, window_bounds = array<i64: 38, 64>}, {pipeline_mode = #tpu.pipeline_mode<synchronous>, transform_indices = @transform_2, window_bounds = array<i64: 1, 64>}, {pipeline_mode = #tpu.pipeline_mode<synchronous>, transform_indices = @transform_3, window_bounds = array<i64: 64, 32>}, {pipeline_mode = #tpu.pipeline_mode<synchronous>, transform_indices = @transform_4, window_bounds = array<i64: 1, 32>}, {pipeline_mode = #tpu.pipeline_mode<synchronous>, transform_indices = @transform_5, window_bounds = array<i64: 32, 1>}, {pipeline_mode = #tpu.pipeline_mode<synchronous>, transform_indices = @transform_6, window_bounds = array<i64: 1, 1>}, {transform_indices = @transform_7, window_bounds = array<i64: 8, 1>}, {transform_indices = @transform_8, window_bounds = array<i64: 8, 1>}]} {
    %c0 = arith.constant 0 : index
    %c0_0 = arith.constant 0 : index
    %0 = vector.load %arg1[%c0, %c0_0] : memref<8x38xf32, #tpu.memory_space<vmem>>, vector<8x38xf32>
    %c0_1 = arith.constant 0 : index
    %c0_2 = arith.constant 0 : index
    %1 = vector.load %arg2[%c0_1, %c0_2] : memref<38x64xf32, #tpu.memory_space<vmem>>, vector<38x64xf32>
    %c0_3 = arith.constant 0 : index
    %c0_4 = arith.constant 0 : index
    %2 = vector.load %arg3[%c0_3, %c0_4] : memref<1x64xf32, #tpu.memory_space<vmem>>, vector<1x64xf32>
    %cst = arith.constant dense<0.000000e+00> : vector<8x64xf32>
    %3 = tpu.matmul %0, %1, %cst {dimension_numbers = #tpu.dot_dimension_numbers<[1], [0], [0], [1], [0, 0, 1, 1], [], []>} : vector<8x38xf32>, vector<38x64xf32>, vector<8x64xf32> -> vector<8x64xf32>
    %4 = vector.broadcast %2 : vector<1x64xf32> to vector<8x64xf32>
    %5 = arith.addf %3, %4 : vector<8x64xf32>
    %cst_5 = arith.constant 0.000000e+00 : f32
    %6 = vector.broadcast %cst_5 : f32 to vector<8x64xf32>
    %7 = arith.cmpf ogt, %5, %6 : vector<8x64xf32>
    %cst_6 = arith.constant 2.000000e-01 : f32
    %8 = vector.broadcast %cst_6 : f32 to vector<8x64xf32>
    %9 = arith.mulf %8, %5 : vector<8x64xf32>
    %10 = arith.select %7, %5, %9 : vector<8x64xi1>, vector<8x64xf32>
    %c0_7 = arith.constant 0 : index
    %c0_8 = arith.constant 0 : index
    %11 = vector.load %arg4[%c0_7, %c0_8] : memref<64x32xf32, #tpu.memory_space<vmem>>, vector<64x32xf32>
    %c0_9 = arith.constant 0 : index
    %c0_10 = arith.constant 0 : index
    %12 = vector.load %arg5[%c0_9, %c0_10] : memref<1x32xf32, #tpu.memory_space<vmem>>, vector<1x32xf32>
    %cst_11 = arith.constant dense<0.000000e+00> : vector<8x32xf32>
    %13 = tpu.matmul %10, %11, %cst_11 {dimension_numbers = #tpu.dot_dimension_numbers<[1], [0], [0], [1], [0, 0, 1, 1], [], []>} : vector<8x64xf32>, vector<64x32xf32>, vector<8x32xf32> -> vector<8x32xf32>
    %14 = vector.broadcast %12 : vector<1x32xf32> to vector<8x32xf32>
    %15 = arith.addf %13, %14 : vector<8x32xf32>
    %cst_12 = arith.constant 0.000000e+00 : f32
    %16 = vector.broadcast %cst_12 : f32 to vector<8x32xf32>
    %17 = arith.cmpf ogt, %15, %16 : vector<8x32xf32>
    %cst_13 = arith.constant 2.000000e-01 : f32
    %18 = vector.broadcast %cst_13 : f32 to vector<8x32xf32>
    %19 = arith.mulf %18, %15 : vector<8x32xf32>
    %20 = arith.select %17, %15, %19 : vector<8x32xi1>, vector<8x32xf32>
    %c0_14 = arith.constant 0 : index
    %c0_15 = arith.constant 0 : index
    %21 = vector.load %arg6[%c0_14, %c0_15] : memref<32x1xf32, #tpu.memory_space<vmem>>, vector<32x1xf32>
    %c0_16 = arith.constant 0 : index
    %c0_17 = arith.constant 0 : index
    %22 = vector.load %arg7[%c0_16, %c0_17] : memref<1x1xf32, #tpu.memory_space<vmem>>, vector<1x1xf32>
    %cst_18 = arith.constant dense<0.000000e+00> : vector<8x1xf32>
    %23 = tpu.matmul %20, %21, %cst_18 {dimension_numbers = #tpu.dot_dimension_numbers<[1], [0], [0], [1], [0, 0, 1, 1], [], []>} : vector<8x32xf32>, vector<32x1xf32>, vector<8x1xf32> -> vector<8x1xf32>
    %24 = vector.broadcast %22 : vector<1x1xf32> to vector<8x1xf32>
    %25 = arith.addf %23, %24 : vector<8x1xf32>
    %26 = arith.negf %25 : vector<8x1xf32>
    %27 = math.exp %26 : vector<8x1xf32>
    %cst_19 = arith.constant 1.000000e+00 : f32
    %28 = vector.broadcast %cst_19 : f32 to vector<8x1xf32>
    %29 = arith.addf %28, %27 : vector<8x1xf32>
    %30 = arith.divf %28, %29 : vector<8x1xf32>
    %c0_20 = arith.constant 0 : index
    %c0_21 = arith.constant 0 : index
    %31 = vector.load %arg8[%c0_20, %c0_21] : memref<8x1xf32, #tpu.memory_space<vmem>>, vector<8x1xf32>
    tpu.vector_store %arg8[%c0_20, %c0_21], %30 {strides = array<i32>} : memref<8x1xf32, #tpu.memory_space<vmem>>, vector<8x1xf32>,
    %32 = vector.extract_strided_slice %0 {offsets = [0, 16], sizes = [8, 2], strides = [1, 1]} : vector<8x38xf32> to vector<8x2xf32>
    %33 = vector.extract_strided_slice %32 {offsets = [0, 1], sizes = [8, 1], strides = [1, 1]} : vector<8x2xf32> to vector<8x1xf32>
    %34 = vector.extract_strided_slice %32 {offsets = [0, 0], sizes = [8, 1], strides = [1, 1]} : vector<8x2xf32> to vector<8x1xf32>
    %35 = arith.cmpf ogt, %33, %34 : vector<8x1xf32>
    %36 = arith.extui %35 : vector<8x1xi1> to vector<8x1xi32>
    %c0_22 = arith.constant 0 : index
    %c0_23 = arith.constant 0 : index
    %37 = vector.load %arg9[%c0_22, %c0_23] : memref<8x1xi32, #tpu.memory_space<vmem>>, vector<8x1xi32>
    tpu.vector_store %arg9[%c0_22, %c0_23], %36 {strides = array<i32>} : memref<8x1xi32, #tpu.memory_space<vmem>>, vector<8x1xi32>,
    return
  }
  func.func @transform_0(%arg0: i32) -> (i32, i32) {
    %c0_i32 = arith.constant 0 : i32
    %c0_i32_0 = arith.constant 0 : i32
    return %arg0, %c0_i32 : i32, i32
  }
  func.func @transform_1(%arg0: i32) -> (i32, i32) {
    %c0_i32 = arith.constant 0 : i32
    %c0_i32_0 = arith.constant 0 : i32
    %c0_i32_1 = arith.constant 0 : i32
    return %c0_i32, %c0_i32_0 : i32, i32
  }
  func.func @transform_2(%arg0: i32) -> (i32, i32) {
    %c0_i32 = arith.constant 0 : i32
    %c0_i32_0 = arith.constant 0 : i32
    %c0_i32_1 = arith.constant 0 : i32
    return %c0_i32, %c0_i32_0 : i32, i32
  }
  func.func @transform_3(%arg0: i32) -> (i32, i32) {
    %c0_i32 = arith.constant 0 : i32
    %c0_i32_0 = arith.constant 0 : i32
    %c0_i32_1 = arith.constant 0 : i32
    return %c0_i32, %c0_i32_0 : i32, i32
  }
  func.func @transform_4(%arg0: i32) -> (i32, i32) {
    %c0_i32 = arith.constant 0 : i32
    %c0_i32_0 = arith.constant 0 : i32
    %c0_i32_1 = arith.constant 0 : i32
    return %c0_i32, %c0_i32_0 : i32, i32
  }
  func.func @transform_5(%arg0: i32) -> (i32, i32) {
    %c0_i32 = arith.constant 0 : i32
    %c0_i32_0 = arith.constant 0 : i32
    %c0_i32_1 = arith.constant 0 : i32
    return %c0_i32, %c0_i32_0 : i32, i32
  }
  func.func @transform_6(%arg0: i32) -> (i32, i32) {
    %c0_i32 = arith.constant 0 : i32
    %c0_i32_0 = arith.constant 0 : i32
    %c0_i32_1 = arith.constant 0 : i32
    return %c0_i32, %c0_i32_0 : i32, i32
  }
  func.func @transform_7(%arg0: i32) -> (i32, i32) {
    %c0_i32 = arith.constant 0 : i32
    %c0_i32_0 = arith.constant 0 : i32
    return %arg0, %c0_i32 : i32, i32
  }
  func.func @transform_8(%arg0: i32) -> (i32, i32) {
    %c0_i32 = arith.constant 0 : i32
    %c0_i32_0 = arith.constant 0 : i32
    return %arg0, %c0_i32 : i32, i32
  }
}

</mosaic_0001>

<bundles_post_ra>
// kernel: tpu_custom_call.1
= control target key start
LH: loop header
LB: loop body
LE: loop exit
PB: predicated region body
PF: predicated region fallthrough
CT: control target
= control target key end

     0   :  { %vm44_vm0 = vcmask 1045504   ;;  %vm40_vm1 = vcmask 310272   ;;  %vm83_vm3 = vcmask 523264   ;;  %v195_v25 = vmov 0   ;;  %s196_s20 = smov 111   ;;  %s313_s1 = inlined_call_operand.vmem [shape: f32[38,64], index: 1, kind: input, shape index: {}]   ;;  %s314_s3 = inlined_call_operand.vmem [shape: f32[64,32], index: 3, kind: input, shape index: {}]   ;;  %s315_s2 = inlined_call_operand.vmem [shape: f32[1,64], index: 2, kind: input, shape index: {}]   ;;  %s316_s0 = inlined_call_operand.vmem [shape: f32[8,38], index: 0, kind: input, shape index: {}]   ;;  %s317_s4 = inlined_call_operand.vmem [shape: f32[1,32], index: 4, kind: input, shape index: {}]   ;;  %s318_s5 = inlined_call_operand.vmem [shape: f32[32,1], index: 5, kind: input, shape index: {}]   ;;  %s319_s6 = inlined_call_operand.<no memory space> [shape: f32[1,1], index: 6, kind: input, shape index: {}]   ;;  %s320_s8 = inlined_call_operand.vmem [shape: s32[8,1], index: 8, kind: output, shape index: {1}]   ;;  %s321_s7 = inlined_call_operand.vmem [shape: f32[8,1], index: 7, kind: output, shape index: {0}]  }
   0x1   :  { %v35_v0 = vld [vmem:[%s313_s1 + $0x20] sm:$0x3f]  ;;  %v34_v1 = vld [vmem:[%s313_s1 + $0x18] sm:$0xff]  ;;  %v33_v2 = vld [vmem:[%s313_s1 + $0x10] sm:$0xff]  ;;  %v14_v24 = vstv %s319_s6  ;;  %vm118_vm6 = vcmask 261120   ;;  %vm161_vm7 = vcmask 7168  }
   0x2   :  { %179 = vmatpush.msk.msra.mxu0 %vm44_vm0, %v35_v0  ;;  %v78_v3 = vld [vmem:[%s314_s3 + $0x38] sm:$0xff]  ;;  %v77_v4 = vld [vmem:[%s314_s3 + $0x30] sm:$0xff]  ;;  %v32_v5 = vld [vmem:[%s313_s1 + $0x8] sm:$0xff]  ;;  %15 = vst [vmem:[#allocation2] sm:$0x1] %v14_v24 }
   0x3   :  { %95 = vmatpush.msra.mxu1 %v78_v3  ;;  %v76_v6 = vld [vmem:[%s314_s3 + $0x28] sm:$0xff]  ;;  %v31_v7 = vld [vmem:[%s313_s1] sm:$0xff]  ;;  %v74_v10 = vld [vmem:[%s314_s3 + $0x18] sm:$0xff]  ;;  %s194_s1 = smov 1  }
   0x4   :  { %60 = vmatpush.msra.mxu0 %v34_v1  ;;  %v75_v8 = vld [vmem:[%s314_s3 + $0x20] sm:$0xff]  ;;  %v73_v11 = vld [vmem:[%s314_s3 + $0x10] sm:$0xff]  ;;  %v72_v12 = vld [vmem:[%s314_s3 + $0x8] sm:$0xff] }
   0x5   :  { %96 = vmatpush.msra.mxu1 %v77_v4  ;;  %v30_v9 = vld [vmem:[%s316_s0] sm:$0xff]  ;;  %v113_v14 = vld [vmem:[%s318_s5 + $0x18] sm:$0xff]  ;;  %v112_v20 = vld [vmem:[%s318_s5 + $0x10] sm:$0xff] }
   0x6   :  { %61 = vmatpush.msra.mxu0 %v33_v2  ;;  %163 = vrot.lane.b32.xlu0 %v30_v9, %s194_s1  ;;  %v71_v13 = vld [vmem:[%s314_s3] sm:$0xff]  ;;  %v111_v21 = vld [vmem:[%s318_s5 + $0x8] sm:$0xff] }
   0x7   :  { %97 = vmatpush.msra.mxu1 %v76_v6  ;;  %134 = vmatpush.msra.mxu2 %v113_v14  ;;  %v187_v15 = vld [vmem:[%s315_s2] ss:$0 sm:$0xff] }
   0x8   :  { %62 = vmatpush.msra.mxu0 %v32_v5  ;;  %v110_v22 = vld [vmem:[%s318_s5] sm:$0xff] }
   0x9   :  { %98 = vmatpush.msra.mxu1 %v75_v8  ;;  %135 = vmatpush.msra.mxu2 %v112_v20  ;;  %v188_v27 = vld [vmem:[%s317_s4] ss:$0 sm:$0xff] }
   0xa   :  { %63 = vmatpush.msra.mxu0 %v31_v7  ;;  %v189_v33 = vld [vmem:[#allocation2] ss:$0 sm:$0xff] }
   0xb   :  { %180 = vmatmul.msk.f32.vlgmr.msra.gmra.mxu0 %vm40_vm1, %v30_v9  ;;  %99 = vmatpush.msra.mxu1 %v74_v10 }
   0xc   :  { %136 = vmatpush.msra.mxu2 %v111_v21 }
   0xd   :  { %100 = vmatpush.msra.mxu1 %v73_v11 }
   0xe   :  { %137 = vmatpush.msra.mxu2 %v110_v22 }
   0xf   :  { %101 = vmatpush.msra.mxu1 %v72_v12 }
  0x11   :  { %102 = vmatpush.msra.mxu1 %v71_v13 }
  0x78   :  { %v164_v23 = vpop.permute.xlu0 %163 }
  0x79   :  { %vm166_vm4 = vcmp.gt.f32.partialorder %v30_v9, %v164_v23 }
  0x7a   :  { %v167_v26 = vsel %vm166_vm4, 1, %v195_v25 }
  0x7b   :  { %168 = vrot.lane.b32.xlu0 %v167_v26, %s196_s20 }
  0x88   :  { %v65_v16 = vpop.f32.mrf.mxu0 }
  0x89   :  { %v66_v17 = vadd.f32 %v187_v15, %v65_v16 }
  0x8b   :  { %v69_v18 = vmul.f32 0.2, %v66_v17  ;;  %vm68_vm2 = vcmp.gt.f32.partialorder %v66_v17, 0.0 }
  0x8d   :  { %v70_v19 = vsel %vm68_vm2, %v66_v17, %v69_v18 }
  0x8e   :  { %181 = vmatmul.msk.f32.vlgmr.msra.gmra.mxu1 %vm83_vm3, %v70_v19 }
  0xed   :  { %v169_v32 = vpop.permute.xlu0 %168 }
  0xee   :  { %170 = vst.msk [vmem:[%s320_s8] sm:$0xff] %vm161_vm7, %v169_v32 }
 0x10b   :  { %v104_v28 = vpop.f32.mrf.mxu1 }
 0x10c   :  { %v105_v29 = vadd.f32 %v188_v27, %v104_v28 }
 0x10e   :  { %v108_v30 = vmul.f32 0.2, %v105_v29  ;;  %vm107_vm5 = vcmp.gt.f32.partialorder %v105_v29, 0.0 }
 0x110   :  { %v109_v31 = vsel %vm107_vm5, %v105_v29, %v108_v30 }
 0x111   :  { %182 = vmatmul.msk.f32.vlgmr.msra.gmra.mxu2 %vm118_vm6, %v109_v31 }
 0x194   :  { %v139_v34 = vpop.f32.mrf.mxu2 }
 0x195   :  { %v140_v35 = vadd.f32 %v189_v33, %v139_v34 }
 0x197   :  { %v183_v36 = vmul.f32 -1.442695, %v140_v35 }
 0x199   :  { %190 = vpow2.f32 %v183_v36 }
 0x19f   :  { %v191_v37 = vpop.eup %190 }
 0x1a0   :  { %v145_v38 = vadd.f32 1.0, %v191_v37 }
 0x1a2   :  { %192 = vrcp.f32 %v145_v38  ;;  %v157_v42 = vand.u32 2147483648, %v145_v38  ;;  %v155_v44 = vand.u32 2147483647, %v145_v38  ;;  %vm151_vm9 = vweird.f32 %v145_v38 }
 0x1a4   :  { %v158_v46 = vor.u32 1.1754944e-38, %v157_v42  ;;  %vm156_vm11 = vcmp.eq.f32.partialorder %v155_v44, 8.507059e+37 }
 0x1a8   :  { %v193_v39 = vpop.eup %192 }
 0x1a9   :  { %v147_v40 = vmul.f32 %v193_v39, %v145_v38  ;;  %vm152_vm8 = vweird.f32 %v193_v39 }
 0x1aa   :  { %vm153_vm10 = vmor %vm151_vm9, %vm152_vm8 }
 0x1ab   :  { %v148_v41 = vsub.f32 1.0, %v147_v40 }
 0x1ad   :  { %v149_v43 = vmul.f32 %v193_v39, %v148_v41 }
 0x1af   :  { %v150_v45 = vadd.f32 %v193_v39, %v149_v43 }
 0x1b1   :  { %v154_v47 = vsel %vm153_vm10, %v193_v39, %v150_v45 }
 0x1b2   :  { %v159_v48 = vsel %vm156_vm11, %v158_v46, %v154_v47 }
 0x1b3   :  { %162 = vst.msk [vmem:[%s321_s7] sm:$0xff] %vm161_vm7, %v159_v48 }

</bundles_post_ra>
